<compile_context>
chip_gen: v5e
topology: v5e:2x2
jax: 0.10.0
libtpu: 0.0.40
codegen_flags: <defaults>
</compile_context>

<pallas_src>
import jax
import jax.numpy as jnp
from jax.experimental import pallas as pl
from jax.experimental.pallas import tpu as pltpu


def _round_up(n: int, m: int) -> int:
    return ((n + m - 1) // m) * m


def mlp_kernel(x_ref,
               w1_ref, b1_ref,
               w2_ref, b2_ref,
               w3_ref, b3_ref,
               w4_ref, b4_ref,
               o_ref):
    x = x_ref[...]            # (TB, 3)  f32
    w1 = w1_ref[...]          # (3, 64)  f32

    # ---- fc1 + relu : K=3 -> 3 VPU broadcast FMAs instead of a padded MXU dot ----
    h = b1_ref[...] + x[:, 0:1] * w1[0:1, :]
    h = h + x[:, 1:2] * w1[1:2, :]
    h = h + x[:, 2:3] * w1[2:3, :]
    h = jnp.maximum(h, 0.0)

    # ---- fc2 + relu : bf16 MXU operands, f32 accumulate, f32 bias/relu ----
    h = jnp.dot(h.astype(jnp.bfloat16), w2_ref[...],
                preferred_element_type=jnp.float32) + b2_ref[...]
    h = jnp.maximum(h, 0.0)

    # ---- fc3 + relu ----
    h = jnp.dot(h.astype(jnp.bfloat16), w3_ref[...],
                preferred_element_type=jnp.float32) + b3_ref[...]
    h = jnp.maximum(h, 0.0)

    # ---- fc4 (no activation) ----
    h = jnp.dot(h.astype(jnp.bfloat16), w4_ref[...],
                preferred_element_type=jnp.float32) + b4_ref[...]

    o_ref[...] = h.astype(o_ref.dtype)


def imu_classifier_forward(x, params, *, tb: int = 1024):
    """x: (batch, 3) float32. params: dict of weights/biases. Returns (batch, 3) f32."""
    batch = x.shape[0]

    # Batch tile: multiple of 8 (f32 sublane), capped by the (padded) batch size.
    tb_eff = min(tb, _round_up(batch, 8))
    tb_eff = _round_up(tb_eff, 8)
    padded = _round_up(batch, tb_eff)
    if padded != batch:
        x = jnp.pad(x, ((0, padded - batch), (0, 0)))

    grid = (padded // tb_eff,)

    w1, b1 = params["w1"], params["b1"]
    w2, b2 = params["w2"], params["b2"]
    w3, b3 = params["w3"], params["b3"]
    w4, b4 = params["w4"], params["b4"]

    def const_spec(arr):
        # Full-array block, same block every grid step -> pinned resident in VMEM.
        return pl.BlockSpec(arr.shape, lambda i: (0, 0))

    x_spec = pl.BlockSpec((tb_eff, 3), lambda i: (i, 0))
    out_spec = pl.BlockSpec((tb_eff, 3), lambda i: (i, 0))

    flops = 2 * padded * (3 * 64 + 64 * 128 + 128 * 64 + 64 * 3)
    bytes_accessed = (
        padded * 3 * 4            # x in
        + padded * 3 * 4          # out
        + (3 * 64) * 4            # w1 (f32)
        + (64 * 128 + 128 * 64 + 64 * 3) * 2   # w2/w3/w4 (bf16)
        + (64 + 128 + 64 + 3) * 4              # biases (f32)
    )

    out = pl.pallas_call(
        mlp_kernel,
        out_shape=jax.ShapeDtypeStruct((padded, 3), jnp.float32),
        grid=grid,
        in_specs=[
            x_spec,
            const_spec(w1), const_spec(b1),
            const_spec(w2), const_spec(b2),
            const_spec(w3), const_spec(b3),
            const_spec(w4), const_spec(b4),
        ],
        out_specs=out_spec,
        compiler_params=pltpu.CompilerParams(
            dimension_semantics=("parallel",)),
        cost_estimate=pl.CostEstimate(
            flops=flops, transcendentals=0, bytes_accessed=bytes_accessed),
    )(x, w1, b1, w2, b2, w3, b3, w4, b4)

    return out[:batch]


def init_params(key):
    """Deterministic init mirroring nn.Linear shapes (uniform, PyTorch-style bound).

    Weights stored (in_features, out_features) so the kernel does x @ W + b.
    fc2/fc3/fc4 weights are bf16 (MXU operands); fc1 weight and all biases stay f32.
    """
    dims = [(3, 64), (64, 128), (128, 64), (64, 3)]
    params = {}
    keys = jax.random.split(key, 2 * len(dims))
    for i, (fan_in, fan_out) in enumerate(dims):
        bound = 1.0 / jnp.sqrt(jnp.float32(fan_in))
        w = jax.random.uniform(keys[2 * i], (fan_in, fan_out),
                               minval=-bound, maxval=bound, dtype=jnp.float32)
        b = jax.random.uniform(keys[2 * i + 1], (1, fan_out),
                               minval=-bound, maxval=bound, dtype=jnp.float32)
        if i > 0:  # fc2/fc3/fc4 -> bf16 MXU operands
            w = w.astype(jnp.bfloat16)
        params[f"w{i + 1}"] = w
        params[f"b{i + 1}"] = b
    return params


def reference_forward(x, params):
    """Pure-JAX reference mirroring the kernel's numerics (bf16 dot operands, f32 acc)."""
    h = jnp.maximum(x @ params["w1"] + params["b1"], 0.0)
    h = jnp.dot(h.astype(jnp.bfloat16), params["w2"],
                preferred_element_type=jnp.float32) + params["b2"]
    h = jnp.maximum(h, 0.0)
    h = jnp.dot(h.astype(jnp.bfloat16), params["w3"],
                preferred_element_type=jnp.float32) + params["b3"]
    h = jnp.maximum(h, 0.0)
    h = jnp.dot(h.astype(jnp.bfloat16), params["w4"],
                preferred_element_type=jnp.float32) + params["b4"]
    return h


if __name__ == "__main__":
    key = jax.random.PRNGKey(0)
    pkey, xkey = jax.random.split(key)
    params = init_params(pkey)

    batch = 8
    x = jax.random.normal(xkey, (batch, 3), dtype=jnp.float32)

    out = imu_classifier_forward(x, params)
    out = jax.block_until_ready(out)

    ref = reference_forward(x, params)
    assert out.shape == (batch, 3)
    assert jnp.allclose(out, ref, atol=1e-2, rtol=1e-2), "mismatch vs reference"
    print("KERNEL_OK")
</pallas_src>

<mosaic_0001>
module attributes {stable_mosaic.version = 11 : i64} {
  func.func @mlp_kernel(%arg0: i32, %arg1: memref<8x3xf32, #tpu.memory_space<vmem>>, %arg2: memref<3x64xf32, #tpu.memory_space<vmem>>, %arg3: memref<1x64xf32, #tpu.memory_space<vmem>>, %arg4: memref<64x128xbf16, #tpu.memory_space<vmem>>, %arg5: memref<1x128xf32, #tpu.memory_space<vmem>>, %arg6: memref<128x64xbf16, #tpu.memory_space<vmem>>, %arg7: memref<1x64xf32, #tpu.memory_space<vmem>>, %arg8: memref<64x3xbf16, #tpu.memory_space<vmem>>, %arg9: memref<1x3xf32, #tpu.memory_space<vmem>>, %arg10: memref<8x3xf32, #tpu.memory_space<vmem>>) attributes {dimension_semantics = [#tpu.dimension_semantics<parallel>], iteration_bounds = array<i64: 1>, scalar_prefetch = 0 : i64, scratch_operands = 0 : i64, tpu.core_type = #tpu.core_type<tc>, window_params = [{transform_indices = @transform_0, window_bounds = array<i64: 8, 3>}, {pipeline_mode = #tpu.pipeline_mode<synchronous>, transform_indices = @transform_1, window_bounds = array<i64: 3, 64>}, {pipeline_mode = #tpu.pipeline_mode<synchronous>, transform_indices = @transform_2, window_bounds = array<i64: 1, 64>}, {pipeline_mode = #tpu.pipeline_mode<synchronous>, transform_indices = @transform_3, window_bounds = array<i64: 64, 128>}, {pipeline_mode = #tpu.pipeline_mode<synchronous>, transform_indices = @transform_4, window_bounds = array<i64: 1, 128>}, {pipeline_mode = #tpu.pipeline_mode<synchronous>, transform_indices = @transform_5, window_bounds = array<i64: 128, 64>}, {pipeline_mode = #tpu.pipeline_mode<synchronous>, transform_indices = @transform_6, window_bounds = array<i64: 1, 64>}, {pipeline_mode = #tpu.pipeline_mode<synchronous>, transform_indices = @transform_7, window_bounds = array<i64: 64, 3>}, {pipeline_mode = #tpu.pipeline_mode<synchronous>, transform_indices = @transform_8, window_bounds = array<i64: 1, 3>}, {transform_indices = @transform_9, window_bounds = array<i64: 8, 3>}]} {
    %c0 = arith.constant 0 : index
    %c0_0 = arith.constant 0 : index
    %0 = vector.load %arg1[%c0, %c0_0] : memref<8x3xf32, #tpu.memory_space<vmem>>, vector<8x3xf32>
    %c0_1 = arith.constant 0 : index
    %c0_2 = arith.constant 0 : index
    %1 = vector.load %arg2[%c0_1, %c0_2] : memref<3x64xf32, #tpu.memory_space<vmem>>, vector<3x64xf32>
    %c0_3 = arith.constant 0 : index
    %c0_4 = arith.constant 0 : index
    %2 = vector.load %arg3[%c0_3, %c0_4] : memref<1x64xf32, #tpu.memory_space<vmem>>, vector<1x64xf32>
    %3 = vector.extract_strided_slice %0 {offsets = [0, 0], sizes = [8, 1], strides = [1, 1]} : vector<8x3xf32> to vector<8x1xf32>
    %4 = vector.extract_strided_slice %1 {offsets = [0, 0], sizes = [1, 64], strides = [1, 1]} : vector<3x64xf32> to vector<1x64xf32>
    %5 = vector.broadcast %3 : vector<8x1xf32> to vector<8x64xf32>
    %6 = vector.broadcast %4 : vector<1x64xf32> to vector<8x64xf32>
    %7 = arith.mulf %5, %6 : vector<8x64xf32>
    %8 = vector.broadcast %2 : vector<1x64xf32> to vector<8x64xf32>
    %9 = arith.addf %8, %7 : vector<8x64xf32>
    %10 = vector.extract_strided_slice %0 {offsets = [0, 1], sizes = [8, 1], strides = [1, 1]} : vector<8x3xf32> to vector<8x1xf32>
    %11 = vector.extract_strided_slice %1 {offsets = [1, 0], sizes = [1, 64], strides = [1, 1]} : vector<3x64xf32> to vector<1x64xf32>
    %12 = vector.broadcast %10 : vector<8x1xf32> to vector<8x64xf32>
    %13 = vector.broadcast %11 : vector<1x64xf32> to vector<8x64xf32>
    %14 = arith.mulf %12, %13 : vector<8x64xf32>
    %15 = arith.addf %9, %14 : vector<8x64xf32>
    %16 = vector.extract_strided_slice %0 {offsets = [0, 2], sizes = [8, 1], strides = [1, 1]} : vector<8x3xf32> to vector<8x1xf32>
    %17 = vector.extract_strided_slice %1 {offsets = [2, 0], sizes = [1, 64], strides = [1, 1]} : vector<3x64xf32> to vector<1x64xf32>
    %18 = vector.broadcast %16 : vector<8x1xf32> to vector<8x64xf32>
    %19 = vector.broadcast %17 : vector<1x64xf32> to vector<8x64xf32>
    %20 = arith.mulf %18, %19 : vector<8x64xf32>
    %21 = arith.addf %15, %20 : vector<8x64xf32>
    %cst = arith.constant 0.000000e+00 : f32
    %22 = vector.broadcast %cst : f32 to vector<8x64xf32>
    %23 = arith.maximumf %21, %22 : vector<8x64xf32>
    %24 = arith.truncf %23 : vector<8x64xf32> to vector<8x64xbf16>
    %c0_5 = arith.constant 0 : index
    %c0_6 = arith.constant 0 : index
    %25 = vector.load %arg4[%c0_5, %c0_6] : memref<64x128xbf16, #tpu.memory_space<vmem>>, vector<64x128xbf16>
    %cst_7 = arith.constant dense<0.000000e+00> : vector<8x128xf32>
    %26 = tpu.matmul %24, %25, %cst_7 {dimension_numbers = #tpu.dot_dimension_numbers<[1], [0], [0], [1], [0, 0, 1, 1], [], []>} : vector<8x64xbf16>, vector<64x128xbf16>, vector<8x128xf32> -> vector<8x128xf32>
    %c0_8 = arith.constant 0 : index
    %c0_9 = arith.constant 0 : index
    %27 = vector.load %arg5[%c0_8, %c0_9] : memref<1x128xf32, #tpu.memory_space<vmem>>, vector<1x128xf32>
    %28 = vector.broadcast %27 : vector<1x128xf32> to vector<8x128xf32>
    %29 = arith.addf %26, %28 : vector<8x128xf32>
    %cst_10 = arith.constant 0.000000e+00 : f32
    %30 = vector.broadcast %cst_10 : f32 to vector<8x128xf32>
    %31 = arith.maximumf %29, %30 : vector<8x128xf32>
    %32 = arith.truncf %31 : vector<8x128xf32> to vector<8x128xbf16>
    %c0_11 = arith.constant 0 : index
    %c0_12 = arith.constant 0 : index
    %33 = vector.load %arg6[%c0_11, %c0_12] : memref<128x64xbf16, #tpu.memory_space<vmem>>, vector<128x64xbf16>
    %cst_13 = arith.constant dense<0.000000e+00> : vector<8x64xf32>
    %34 = tpu.matmul %32, %33, %cst_13 {dimension_numbers = #tpu.dot_dimension_numbers<[1], [0], [0], [1], [0, 0, 1, 1], [], []>} : vector<8x128xbf16>, vector<128x64xbf16>, vector<8x64xf32> -> vector<8x64xf32>
    %c0_14 = arith.constant 0 : index
    %c0_15 = arith.constant 0 : index
    %35 = vector.load %arg7[%c0_14, %c0_15] : memref<1x64xf32, #tpu.memory_space<vmem>>, vector<1x64xf32>
    %36 = vector.broadcast %35 : vector<1x64xf32> to vector<8x64xf32>
    %37 = arith.addf %34, %36 : vector<8x64xf32>
    %cst_16 = arith.constant 0.000000e+00 : f32
    %38 = vector.broadcast %cst_16 : f32 to vector<8x64xf32>
    %39 = arith.maximumf %37, %38 : vector<8x64xf32>
    %40 = arith.truncf %39 : vector<8x64xf32> to vector<8x64xbf16>
    %c0_17 = arith.constant 0 : index
    %c0_18 = arith.constant 0 : index
    %41 = vector.load %arg8[%c0_17, %c0_18] : memref<64x3xbf16, #tpu.memory_space<vmem>>, vector<64x3xbf16>
    %cst_19 = arith.constant dense<0.000000e+00> : vector<8x3xf32>
    %42 = tpu.matmul %40, %41, %cst_19 {dimension_numbers = #tpu.dot_dimension_numbers<[1], [0], [0], [1], [0, 0, 1, 1], [], []>} : vector<8x64xbf16>, vector<64x3xbf16>, vector<8x3xf32> -> vector<8x3xf32>
    %c0_20 = arith.constant 0 : index
    %c0_21 = arith.constant 0 : index
    %43 = vector.load %arg9[%c0_20, %c0_21] : memref<1x3xf32, #tpu.memory_space<vmem>>, vector<1x3xf32>
    %44 = vector.broadcast %43 : vector<1x3xf32> to vector<8x3xf32>
    %45 = arith.addf %42, %44 : vector<8x3xf32>
    %c0_22 = arith.constant 0 : index
    %c0_23 = arith.constant 0 : index
    %46 = vector.load %arg10[%c0_22, %c0_23] : memref<8x3xf32, #tpu.memory_space<vmem>>, vector<8x3xf32>
    tpu.vector_store %arg10[%c0_22, %c0_23], %45 {strides = array<i32>} : memref<8x3xf32, #tpu.memory_space<vmem>>, vector<8x3xf32>,
    return
  }
  func.func @transform_0(%arg0: i32) -> (i32, i32) {
    %c0_i32 = arith.constant 0 : i32
    %c0_i32_0 = arith.constant 0 : i32
    return %arg0, %c0_i32 : i32, i32
  }
  func.func @transform_1(%arg0: i32) -> (i32, i32) {
    %c0_i32 = arith.constant 0 : i32
    %c0_i32_0 = arith.constant 0 : i32
    %c0_i32_1 = arith.constant 0 : i32
    return %c0_i32, %c0_i32_0 : i32, i32
  }
  func.func @transform_2(%arg0: i32) -> (i32, i32) {
    %c0_i32 = arith.constant 0 : i32
    %c0_i32_0 = arith.constant 0 : i32
    %c0_i32_1 = arith.constant 0 : i32
    return %c0_i32, %c0_i32_0 : i32, i32
  }
  func.func @transform_3(%arg0: i32) -> (i32, i32) {
    %c0_i32 = arith.constant 0 : i32
    %c0_i32_0 = arith.constant 0 : i32
    %c0_i32_1 = arith.constant 0 : i32
    return %c0_i32, %c0_i32_0 : i32, i32
  }
  func.func @transform_4(%arg0: i32) -> (i32, i32) {
    %c0_i32 = arith.constant 0 : i32
    %c0_i32_0 = arith.constant 0 : i32
    %c0_i32_1 = arith.constant 0 : i32
    return %c0_i32, %c0_i32_0 : i32, i32
  }
  func.func @transform_5(%arg0: i32) -> (i32, i32) {
    %c0_i32 = arith.constant 0 : i32
    %c0_i32_0 = arith.constant 0 : i32
    %c0_i32_1 = arith.constant 0 : i32
    return %c0_i32, %c0_i32_0 : i32, i32
  }
  func.func @transform_6(%arg0: i32) -> (i32, i32) {
    %c0_i32 = arith.constant 0 : i32
    %c0_i32_0 = arith.constant 0 : i32
    %c0_i32_1 = arith.constant 0 : i32
    return %c0_i32, %c0_i32_0 : i32, i32
  }
  func.func @transform_7(%arg0: i32) -> (i32, i32) {
    %c0_i32 = arith.constant 0 : i32
    %c0_i32_0 = arith.constant 0 : i32
    %c0_i32_1 = arith.constant 0 : i32
    return %c0_i32, %c0_i32_0 : i32, i32
  }
  func.func @transform_8(%arg0: i32) -> (i32, i32) {
    %c0_i32 = arith.constant 0 : i32
    %c0_i32_0 = arith.constant 0 : i32
    %c0_i32_1 = arith.constant 0 : i32
    return %c0_i32, %c0_i32_0 : i32, i32
  }
  func.func @transform_9(%arg0: i32) -> (i32, i32) {
    %c0_i32 = arith.constant 0 : i32
    %c0_i32_0 = arith.constant 0 : i32
    return %arg0, %c0_i32 : i32, i32
  }
}

</mosaic_0001>

<bundles_post_ra>
// kernel: tpu_custom_call.1
= control target key start
LH: loop header
LB: loop body
LE: loop exit
PB: predicated region body
PF: predicated region fallthrough
CT: control target
= control target key end

     0   :  { %v352_v0 = vmov 0   ;;  %v353_v2 = vmov 2   ;;  %v354_v3 = vmov 1   ;;  %vm99_vm0 = vcmask 523264   ;;  %s476_s0 = inlined_call_operand.vmem [shape: f32[8,3], index: 0, kind: input, shape index: {}]   ;;  %s477_s2 = inlined_call_operand.vmem [shape: f32[1,64], index: 2, kind: input, shape index: {}]   ;;  %s478_s4 = inlined_call_operand.vmem [shape: f32[1,128], index: 4, kind: input, shape index: {}]   ;;  %s479_s3 = inlined_call_operand.vmem [shape: bf16[64,128], index: 3, kind: input, shape index: {}]   ;;  %s480_s5 = inlined_call_operand.vmem [shape: bf16[128,64], index: 5, kind: input, shape index: {}]   ;;  %s481_s1 = inlined_call_operand.vmem [shape: f32[3,64], index: 1, kind: input, shape index: {}]   ;;  %s482_s6 = inlined_call_operand.vmem [shape: f32[1,64], index: 6, kind: input, shape index: {}]   ;;  %s483_s7 = inlined_call_operand.vmem [shape: bf16[64,3], index: 7, kind: input, shape index: {}]   ;;  %s484_s8 = inlined_call_operand.vmem [shape: f32[1,3], index: 8, kind: input, shape index: {}]   ;;  %s485_s9 = inlined_call_operand.vmem [shape: f32[8,3], index: 9, kind: output, shape index: {}]  }
   0x1   :  { %344 = vset.pattern.permute.xlu0 %v352_v0  ;;  %v33_v1 = vld [vmem:[%s476_s0] sm:$0xff]  ;;  %346 = vset.pattern.permute.xlu1 %v353_v2  ;;  %v328_v4 = vld [vmem:[%s479_s3 + $0x18] sm:$0xff]  ;;  %v327_v5 = vld [vmem:[%s479_s3 + $0x10] sm:$0xff]  ;;  %vm253_vm1 = vcmask 23552  }
   0x2   :  { %38 = vperm.xlu0 %344, %v33_v1   ;;  %55 = vperm.xlu1 %346, %v33_v1   ;;  %v326_v6 = vld [vmem:[%s479_s3 + $0x8] sm:$0xff]  ;;  %v325_v7 = vld [vmem:[%s479_s3] sm:$0xff]  ;;  %v336_v8 = vld [vmem:[%s480_s5 + $0x38] sm:$0xff] }
   0x3   :  { %107 = vmatpush.bf16.msra.mxu0 %v328_v4  ;;  %186 = vmatpush.bf16.msra.mxu1 %v336_v8  ;;  %v335_v9 = vld [vmem:[%s480_s5 + $0x30] sm:$0xff]  ;;  %v334_v10 = vld [vmem:[%s480_s5 + $0x28] sm:$0xff]  ;;  %v333_v11 = vld [vmem:[%s480_s5 + $0x20] sm:$0xff] }
   0x4   :  { %v34_v12 = vld [vmem:[%s481_s1] sm:$0x7]  ;;  %v332_v15 = vld [vmem:[%s480_s5 + $0x18] sm:$0xff]  ;;  %v331_v20 = vld [vmem:[%s480_s5 + $0x10] sm:$0xff] }
   0x5   :  { %v41_v14 = vperm.slane %v34_v12, 0  ;;  %v348_v16 = vld [vmem:[%s477_s2] ss:$0 sm:$0xff]  ;;  %v51_v18 = vperm.slane %v34_v12, 1  ;;  %v58_v19 = vperm.slane %v34_v12, 2  ;;  %v330_v30 = vld [vmem:[%s480_s5 + $0x8] sm:$0xff] }
   0x6   :  { %v329_v31 = vld [vmem:[%s480_s5] sm:$0xff]  ;;  %v340_v32 = vld [vmem:[%s483_s7 + $0x18] sm:$0xff]  ;;  %v339_v33 = vld [vmem:[%s483_s7 + $0x10] sm:$0xff] }
   0x7   :  { %108 = vmatpush.bf16.msra.mxu0 %v327_v5  ;;  %187 = vmatpush.bf16.msra.mxu1 %v335_v9  ;;  %v349_v34 = vld [vmem:[%s478_s4] ss:$0 sm:$0xff]  ;;  %v338_v40 = vld [vmem:[%s483_s7 + $0x8] sm:$0xff] }
   0x8   :  { %244 = vmatpush.bf16.msra.mxu2 %v340_v32  ;;  %v337_v41 = vld [vmem:[%s483_s7] sm:$0xff] }
   0x9   :  { %v350_v42 = vld [vmem:[%s482_s6] ss:$0 sm:$0xff] }
   0xa   :  { %345 = vset.pattern.permute.xlu0 %v354_v3  ;;  %v351_v48 = vld [vmem:[%s484_s8] ss:$0 sm:$0xff] }
   0xb   :  { %48 = vperm.xlu0 %345, %v33_v1   ;;  %109 = vmatpush.bf16.msra.mxu0 %v326_v6 }
   0xc   :  { %188 = vmatpush.bf16.msra.mxu1 %v334_v10  ;;  %245 = vmatpush.bf16.msra.mxu2 %v339_v33 }
   0xf   :  { %110 = vmatpush.bf16.msra.mxu0 %v325_v7 }
  0x10   :  { %189 = vmatpush.bf16.msra.mxu1 %v333_v11  ;;  %246 = vmatpush.bf16.msra.mxu2 %v338_v40 }
  0x13   :  { %347 = vset.pattern.permute.xlu0 %v353_v2 }
  0x14   :  { %190 = vmatpush.bf16.msra.mxu1 %v332_v15  ;;  %247 = vmatpush.bf16.msra.mxu2 %v337_v41 }
  0x18   :  { %191 = vmatpush.bf16.msra.mxu1 %v331_v20 }
  0x1c   :  { %192 = vmatpush.bf16.msra.mxu1 %v330_v30 }
  0x20   :  { %193 = vmatpush.bf16.msra.mxu1 %v329_v31 }
  0x74   :  { %v39_v13 = vpop.permute.xlu0 %38  ;;  %v56_v21 = vpop.permute.xlu1 %55 }
  0x75   :  { %v42_v17 = vmul.f32 %v41_v14, %v39_v13  ;;  %v59_v25 = vmul.f32 %v58_v19, %v56_v21 }
  0x77   :  { %v46_v23 = vadd.f32 %v348_v16, %v42_v17 }
  0x7d   :  { %v49_v22 = vpop.permute.xlu0 %48 }
  0x7e   :  { %v52_v24 = vmul.f32 %v51_v18, %v49_v22 }
  0x80   :  { %v53_v26 = vadd.f32 %v52_v24, %v46_v23 }
  0x82   :  { %v60_v27 = vadd.f32 %v59_v25, %v53_v26 }
  0x84   :  { %v61_v28 = vmax.f32 %v60_v27, 0.0 }
  0x86   :  { %v62_v29 = vpack.c.bf16 %v61_v28, %v61_v28 }
  0x88   :  { %275 = vmatmul.msk.bf16.vlgmr.msra.gmra.mxu0 %vm99_vm0, %v62_v29 }
 0x105   :  { %v112_v35 = vpop.f32.mrf.mxu0 }
 0x106   :  { %v113_v36 = vadd.f32 %v349_v34, %v112_v35 }
 0x108   :  { %v116_v37 = vmax.f32 %v113_v36, 0.0 }
 0x10a   :  { %v117_v38 = vpack.c.bf16 %v116_v37, %v116_v37 }
 0x10c   :  { %194 = vmatmul.bf16.vlgmr.msra.gmra.mxu1 %v117_v38 }
 0x10d   :  { %v114_v39 = vpop.f32.mrf.mxu0 }
 0x189   :  { %v195_v43 = vpop.f32.mrf.mxu1 }
 0x18a   :  { %v196_v44 = vadd.f32 %v350_v42, %v195_v43 }
 0x18c   :  { %v199_v45 = vmax.f32 %v196_v44, 0.0 }
 0x18e   :  { %v200_v46 = vpack.c.bf16 %v199_v45, %v199_v45 }
 0x190   :  { %324 = vmatmul.msk.bf16.vlgmr.msra.gmra.mxu2 %vm99_vm0, %v200_v46 }
 0x191   :  { %v197_v47 = vpop.f32.mrf.mxu1 }
 0x213   :  { %v249_v49 = vpop.f32.mrf.mxu2 }
 0x214   :  { %v250_v50 = vadd.f32 %v351_v48, %v249_v49 }
 0x216   :  { %254 = vst.msk [vmem:[%s485_s9] sm:$0xff] %vm253_vm1, %v250_v50 }
 0x21b   :  { %v251_v51 = vpop.f32.mrf.mxu2 }

</bundles_post_ra>
